<compile_context>
chip_gen: v7x
topology: tpu7x:2x2x1
jax: 0.10.0
libtpu: 0.0.40
codegen_flags: <defaults>
</compile_context>

<pallas_src>
import functools

import jax
import jax.numpy as jnp
from jax.experimental import pallas as pl
from jax.experimental.pallas import tpu as pltpu

_LANE = 128
_SUBLANE = 8
_MAX_UNROLL = 32   # static-unroll threshold for the 128-wide chunk loop


def _accum_chunks(x_ref, nchunks, s, m):
    """Accumulate `nchunks` 128-wide column chunks of x_ref into (TR, 128) f32 s / m."""
    if nchunks <= 0:
        return s, m
    if nchunks <= _MAX_UNROLL:
        for j in range(nchunks):
            c = x_ref[:, j * _LANE:(j + 1) * _LANE].astype(jnp.float32)
            s = s + c
            m = jnp.maximum(m, c)
        return s, m

    def body(j, carry):
        s, m = carry
        off = pl.multiple_of(j * _LANE, _LANE)
        c = x_ref[:, pl.ds(off, _LANE)].astype(jnp.float32)
        return s + c, jnp.maximum(m, c)

    return jax.lax.fori_loop(0, nchunks, body, (s, m), unroll=8)


def _concat_pool_kernel(x_ref, avg_ref, max_ref, sum_acc, max_acc,
                        *, true_l, tile_l, num_k, inv_l):
    """Pool one (TR, tile_l) block; finalize (lane reduce + store) on the last k step."""
    k = pl.program_id(1)

    @pl.when(k == 0)
    def _init():
        sum_acc[...] = jnp.zeros_like(sum_acc)
        max_acc[...] = jnp.full_like(max_acc, -jnp.inf)

    if num_k > 1:
        # Interior tiles: tile_l is a multiple of 128 -> pure elementwise VPU work.
        @pl.when(k < num_k - 1)
        def _interior():
            s, m = _accum_chunks(x_ref, tile_l // _LANE, sum_acc[...], max_acc[...])
            sum_acc[...] = s
            max_acc[...] = m

    # Last tile: only `last_valid` columns are real data (all offsets are static).
    last_valid = true_l - (num_k - 1) * tile_l
    nfull = last_valid // _LANE
    rem = last_valid - nfull * _LANE

    @pl.when(k == num_k - 1)
    def _last_and_finalize():
        s, m = _accum_chunks(x_ref, nfull, sum_acc[...], max_acc[...])
        row_sum = jnp.sum(s, axis=-1, keepdims=True)           # (TR, 1) f32
        row_max = jnp.max(m, axis=-1, keepdims=True)
        if rem:  # <128-wide tail, reduced once (never touches padded columns)
            tail = x_ref[:, nfull * _LANE:last_valid].astype(jnp.float32)
            row_sum = row_sum + jnp.sum(tail, axis=-1, keepdims=True)
            row_max = jnp.maximum(row_max, jnp.max(tail, axis=-1, keepdims=True))
        avg_ref[...] = (row_sum * inv_l).astype(avg_ref.dtype)
        max_ref[...] = row_max.astype(max_ref.dtype)


def _tpu_budgets():
    """(input_budget_bytes, vmem_limit_bytes, two_tensorcores) for this generation."""
    vmem_cap = 64 << 20       # safe default: v7x per-TensorCore VMEM
    two_tc = False
    try:
        kind = jax.devices()[0].device_kind.lower()
        if "v7" in kind:
            vmem_cap, two_tc = 64 << 20, True
        elif "v5" in kind or "v6" in kind:
            vmem_cap = 128 << 20        # single TensorCore, 128 MiB VMEM
    except Exception:
        pass
    input_budget = vmem_cap // 4                    # double-buffered input blocks
    vmem_limit = max(min(vmem_cap - (16 << 20), 100 << 20), 32 << 20)
    return input_budget, vmem_limit, two_tc


def _plan_tiles(R, L, itemsize, input_budget, two_tc, tile_rows=None, tile_len=None):
    """Choose (TR, TL, num_r, num_k). tile_rows / tile_len are test-only overrides."""
    min_tr = R if R < _SUBLANE else _SUBLANE

    # Length tile: full L whenever a min_tr-row double-buffered slab fits the budget.
    if tile_len is not None:
        TL = L if tile_len >= L else max(_LANE, (tile_len // _LANE) * _LANE)
    elif 2 * min_tr * L * itemsize <= input_budget:
        TL = L
    else:
        cap_cols = input_budget // (2 * min_tr * itemsize)
        TL = max(_LANE, (cap_cols // _LANE) * _LANE)
        TL = min(TL, max(_LANE, (L // _LANE) * _LANE))
    num_k = pl.cdiv(L, TL)

    # Row tile: as many rows as fit the budget (cap so the (TR,128) f32 accumulators
    # stay small); partial last row block is allowed, so no divisor search.
    if tile_rows is not None:
        TR = R if tile_rows >= R else max(_SUBLANE, (tile_rows // _SUBLANE) * _SUBLANE)
    else:
        tr_cap = max(min_tr, input_budget // (2 * TL * itemsize))
        tr_cap = min(tr_cap, max(min_tr, input_budget // 4096))   # scratch cap
        TR = R if R <= tr_cap else max(_SUBLANE, (tr_cap // _SUBLANE) * _SUBLANE)
        if two_tc and TR == R and R >= 2 * _SUBLANE:
            # v7x only: give the parallel row axis >= 2 steps so both TCs stream HBM.
            TR = ((R + 1) // 2 + _SUBLANE - 1) // _SUBLANE * _SUBLANE
    num_r = pl.cdiv(R, TR)
    return TR, TL, num_r, num_k


def adaptive_concat_pool1d(x, *, tile_rows=None, tile_len=None):
    """x: (N, C, L) float -> (N, 2C, 1); channels [:C] = mean over L, [C:] = max over L."""
    N, C, L = x.shape
    if not jnp.issubdtype(x.dtype, jnp.floating):
        x = x.astype(jnp.float32)       # torch pooling layers operate on float tensors
    out_dtype = x.dtype
    itemsize = jnp.dtype(x.dtype).itemsize
    R = N * C

    input_budget, vmem_limit, two_tc = _tpu_budgets()
    TR, TL, num_r, num_k = _plan_tiles(R, L, itemsize, input_budget, two_tc,
                                       tile_rows=tile_rows, tile_len=tile_len)

    xr = x.reshape(R, L)                # free reshape: C fills the sublane axis fully

    kernel = functools.partial(_concat_pool_kernel,
                               true_l=L, tile_l=TL, num_k=num_k, inv_l=1.0 / L)

    avg, mx = pl.pallas_call(
        kernel,
        out_shape=(jax.ShapeDtypeStruct((R, 1), out_dtype),
                   jax.ShapeDtypeStruct((R, 1), out_dtype)),
        grid_spec=pltpu.PrefetchScalarGridSpec(
            num_scalar_prefetch=0,
            grid=(num_r, num_k),
            in_specs=[pl.BlockSpec((TR, TL), lambda r, k: (r, k))],
            out_specs=[pl.BlockSpec((TR, 1), lambda r, k: (r, 0)),
                       pl.BlockSpec((TR, 1), lambda r, k: (r, 0))],
            scratch_shapes=[pltpu.VMEM((TR, _LANE), jnp.float32),   # running sum
                            pltpu.VMEM((TR, _LANE), jnp.float32)]), # running max
        compiler_params=pltpu.CompilerParams(
            dimension_semantics=("parallel", "arbitrary"),
            vmem_limit_bytes=vmem_limit),
        cost_estimate=pl.CostEstimate(
            flops=2 * R * L, transcendentals=0,
            bytes_accessed=R * L * itemsize + 2 * R * itemsize),
    )(xr)

    # Reassemble the torch layout (tiny: N*2C elements).
    return jnp.concatenate([avg.reshape(N, C), mx.reshape(N, C)], axis=1)[:, :, None]


def _reference(x):
    xf = x.astype(jnp.float32)
    out = jnp.concatenate([jnp.mean(xf, axis=-1, keepdims=True),
                           jnp.max(xf, axis=-1, keepdims=True)], axis=1)
    return out.astype(x.dtype)


def _check(x, name, atol=1e-5, rtol=1e-5, **kw):
    out = adaptive_concat_pool1d(x, **kw)
    jax.block_until_ready(out)
    N, C, _ = x.shape
    assert out.shape == (N, 2 * C, 1), (name, out.shape)
    ref = _reference(x)
    assert jnp.allclose(out.astype(jnp.float32), ref.astype(jnp.float32),
                        atol=atol, rtol=rtol), f"mismatch vs reference ({name})"


if __name__ == "__main__":
    key = jax.random.PRNGKey(0)
    k1, k2, k3, k4, k5, k6 = jax.random.split(key, 6)

    # 1) Basic SpikeCNN-sized shape: (batch, channels, length).
    _check(jax.random.normal(k1, (2, 4, 16), jnp.float32), "basic")

    # 2) Single tile with a <128 tail (L=200: one full 128-chunk + 72-wide tail).
    _check(jax.random.normal(k2, (3, 8, 200), jnp.float32), "tail")

    # 3) Forced multi-step reduction over L (accumulator init/accumulate/finalize),
    #    small non-multiple-of-8 row count.
    _check(jax.random.normal(k3, (2, 3, 1000), jnp.float32), "tiled_L", tile_len=256)

    # 4) Long row -> fori_loop chunk path (65 full chunks + 30-wide tail).
    _check(jax.random.normal(k4, (1, 2, 8350), jnp.float32), "fori")

    # 5) Forced non-divisor row blocks (R=20, TR=16 -> partial edge row block).
    _check(jax.random.normal(k5, (5, 4, 64), jnp.float32), "partial_rows", tile_rows=16)

    # 6) bf16 input (f32 accumulation inside the kernel).
    _check(jax.random.normal(k6, (2, 4, 300), jnp.float32).astype(jnp.bfloat16),
           "bf16", atol=2e-2, rtol=2e-2)

    print("KERNEL_OK")
</pallas_src>

<mosaic_0001>
module attributes {stable_mosaic.version = 11 : i64} {
  func.func @_concat_pool_kernel(%arg0: i32, %arg1: i32, %arg2: memref<8x16xf32, #tpu.memory_space<vmem>>, %arg3: memref<8x1xf32, #tpu.memory_space<vmem>>, %arg4: memref<8x1xf32, #tpu.memory_space<vmem>>, %arg5: memref<8x128xf32, #tpu.memory_space<vmem>>, %arg6: memref<8x128xf32, #tpu.memory_space<vmem>>) attributes {dimension_semantics = [#tpu.dimension_semantics<parallel>, #tpu.dimension_semantics<arbitrary>], iteration_bounds = array<i64: 1, 1>, scalar_prefetch = 0 : i64, scratch_operands = 2 : i64, tpu.core_type = #tpu.core_type<tc>, window_params = [{transform_indices = @transform_0, window_bounds = array<i64: 8, 16>}, {transform_indices = @transform_1, window_bounds = array<i64: 8, 1>}, {transform_indices = @transform_2, window_bounds = array<i64: 8, 1>}]} {
    %c0_i32 = arith.constant 0 : i32
    %0 = arith.cmpi eq, %arg1, %c0_i32 : i32
    %1 = arith.extui %0 : i1 to i32
    %c0_i32_0 = arith.constant 0 : i32
    %2 = arith.cmpi ne, %1, %c0_i32_0 : i32
    scf.if %2 {
      %cst = arith.constant 0.000000e+00 : f32
      %6 = vector.broadcast %cst : f32 to vector<8x128xf32>
      %c0 = arith.constant 0 : index
      %c0_3 = arith.constant 0 : index
      %7 = vector.load %arg5[%c0, %c0_3] : memref<8x128xf32, #tpu.memory_space<vmem>>, vector<8x128xf32>
      tpu.vector_store %arg5[%c0, %c0_3], %6 {strides = array<i32>} : memref<8x128xf32, #tpu.memory_space<vmem>>, vector<8x128xf32>,
      %cst_4 = arith.constant 0xFF800000 : f32
      %8 = vector.broadcast %cst_4 : f32 to vector<8x128xf32>
      %c0_5 = arith.constant 0 : index
      %c0_6 = arith.constant 0 : index
      %9 = vector.load %arg6[%c0_5, %c0_6] : memref<8x128xf32, #tpu.memory_space<vmem>>, vector<8x128xf32>
      tpu.vector_store %arg6[%c0_5, %c0_6], %8 {strides = array<i32>} : memref<8x128xf32, #tpu.memory_space<vmem>>, vector<8x128xf32>,
    } else {
    }
    %c0_i32_1 = arith.constant 0 : i32
    %3 = arith.cmpi eq, %arg1, %c0_i32_1 : i32
    %4 = arith.extui %3 : i1 to i32
    %c0_i32_2 = arith.constant 0 : i32
    %5 = arith.cmpi ne, %4, %c0_i32_2 : i32
    scf.if %5 {
      %c0 = arith.constant 0 : index
      %c0_3 = arith.constant 0 : index
      %6 = vector.load %arg5[%c0, %c0_3] : memref<8x128xf32, #tpu.memory_space<vmem>>, vector<8x128xf32>
      %c0_4 = arith.constant 0 : index
      %c0_5 = arith.constant 0 : index
      %7 = vector.load %arg6[%c0_4, %c0_5] : memref<8x128xf32, #tpu.memory_space<vmem>>, vector<8x128xf32>
      %cst = arith.constant dense<0.000000e+00> : vector<8xf32>
      %8 = vector.multi_reduction <add>, %6, %cst [1] : vector<8x128xf32> to vector<8xf32>
      %9 = vector.shape_cast %8 : vector<8xf32> to vector<8x1xf32>
      %cst_6 = arith.constant dense<0xFF800000> : vector<8xf32>
      %10 = vector.multi_reduction <maximumf>, %7, %cst_6 [1] : vector<8x128xf32> to vector<8xf32>
      %11 = vector.shape_cast %10 : vector<8xf32> to vector<8x1xf32>
      %c0_7 = arith.constant 0 : index
      %c0_8 = arith.constant 0 : index
      %12 = vector.load %arg2[%c0_7, %c0_8] : memref<8x16xf32, #tpu.memory_space<vmem>>, vector<8x16xf32>
      %cst_9 = arith.constant dense<0.000000e+00> : vector<8xf32>
      %13 = vector.multi_reduction <add>, %12, %cst_9 [1] : vector<8x16xf32> to vector<8xf32>
      %14 = vector.shape_cast %13 : vector<8xf32> to vector<8x1xf32>
      %15 = arith.addf %9, %14 : vector<8x1xf32>
      %cst_10 = arith.constant dense<0xFF800000> : vector<8xf32>
      %16 = vector.multi_reduction <maximumf>, %12, %cst_10 [1] : vector<8x16xf32> to vector<8xf32>
      %17 = vector.shape_cast %16 : vector<8xf32> to vector<8x1xf32>
      %18 = arith.maximumf %11, %17 : vector<8x1xf32>
      %cst_11 = arith.constant 6.250000e-02 : f32
      %19 = vector.broadcast %cst_11 : f32 to vector<8x1xf32>
      %20 = arith.mulf %15, %19 : vector<8x1xf32>
      %c0_12 = arith.constant 0 : index
      %c0_13 = arith.constant 0 : index
      %21 = vector.load %arg3[%c0_12, %c0_13] : memref<8x1xf32, #tpu.memory_space<vmem>>, vector<8x1xf32>
      tpu.vector_store %arg3[%c0_12, %c0_13], %20 {strides = array<i32>} : memref<8x1xf32, #tpu.memory_space<vmem>>, vector<8x1xf32>,
      %c0_14 = arith.constant 0 : index
      %c0_15 = arith.constant 0 : index
      %22 = vector.load %arg4[%c0_14, %c0_15] : memref<8x1xf32, #tpu.memory_space<vmem>>, vector<8x1xf32>
      tpu.vector_store %arg4[%c0_14, %c0_15], %18 {strides = array<i32>} : memref<8x1xf32, #tpu.memory_space<vmem>>, vector<8x1xf32>,
    } else {
    }
    return
  }
  func.func @transform_0(%arg0: i32, %arg1: i32) -> (i32, i32) {
    %c0_i32 = arith.constant 0 : i32
    return %arg0, %arg1 : i32, i32
  }
  func.func @transform_1(%arg0: i32, %arg1: i32) -> (i32, i32) {
    %c0_i32 = arith.constant 0 : i32
    %c0_i32_0 = arith.constant 0 : i32
    return %arg0, %c0_i32 : i32, i32
  }
  func.func @transform_2(%arg0: i32, %arg1: i32) -> (i32, i32) {
    %c0_i32 = arith.constant 0 : i32
    %c0_i32_0 = arith.constant 0 : i32
    return %arg0, %c0_i32 : i32, i32
  }
}

</mosaic_0001>

<bundles_post_ra>
// kernel: tpu_custom_call.1
= control target key start
LH: loop header
LB: loop body
LE: loop exit
PB: predicated region body
PF: predicated region fallthrough
CT: control target
= control target key end

     0   :  { %8 = vsyncpa [#allocation5], 0  ;;  %s84_s9 = smov [#allocation4]   ;;  %s120_s0 = inlined_call_operand.hbm [shape: f32[8,16], index: 0, kind: input, shape index: {}]   ;;  %s121_s1 = inlined_call_operand.vmem [shape: f32[8,1], index: 1, kind: output, shape index: {0}]   ;;  %s122_s2 = inlined_call_operand.vmem [shape: f32[8,1], index: 2, kind: output, shape index: {1}]  }
   0x1   :  { %s15_s10 = sshll.u32 %s84_s9, 4  ;;  %s60_s13 = scalar_lea.hbm %s120_s0, 128  ;;  %s16_s10 = int_to_ptr.vmem [resolvable:$true] %s15_s10 }
   0x2   :  { %p61_p0 = scmp.ne.s32.totalorder %s120_s0, %s60_s13  ;;  %p64_p1 = scmp.lt.u32.totalorder %s60_s13, %s120_s0 }
   0x4   :  { %p66_p2 = pnand %p64_p1, %p61_p0 }
   0x6   :  { %69 = shalt.err (!%p66_p2)
}
   0x7   :  { %s70_s18 = scalar_lea.vmem %s16_s10, 128  ;;  %p75_p4 = scmp.lt.s32.totalorder %s16_s10, %s16_s10 }
   0x8   :  { %p71_p3 = scmp.ne.s32.totalorder %s16_s10, %s70_s18  ;;  %p76_p5 = scmp.lt.s32.totalorder %s70_s18, %s70_s18 }
   0xa   :  { %p77_p6 = por %p76_p5, %p75_p4 }
   0xc   :  { %p78_p7 = pnand %p77_p6, %p71_p3 }
   0xe   :  { %81 = shalt.err (!%p78_p7)
}
   0xf   :  { %18 = dma.hbm_to_vmem [thread:$0]  %s120_s0, 128, %s16_s10, [#allocation5]  }
  0x10   :  { %82 = dma.done.wait [#allocation5], 128  }
  0x11   :  { %83 = vsyncadd [#allocation5], 4294967168  ;;  %v85_v0 = vmov -inf   ;;  %v86_v1 = vmov 0.0   ;;  %vm35_vm0 = vcmask 130048   ;;  %v34_v2 = vld [vmem:[#allocation4] sm:$0xff] }
  0x12   :  { %32 = vmax.xlane.f32.xlu1 %v85_v0  ;;  %30 = vadd.xlane.f32.xlu0 %v86_v1  ;;  %v40_v3 = vsel %vm35_vm0, %v34_v2, -inf  ;;  %v36_v4 = vsel %vm35_vm0, %v34_v2, 0.0  ;;  %vm45_vm1 = vcmask 7168  }
  0x16   :  { %41 = vmax.xlane.f32.xlu1 %v40_v3  ;;  %37 = vadd.xlane.f32.xlu0 %v36_v4 }
  0x9f   :  { %v33_v5 = vpop.xlane.xlu1 %32  ;;  %v31_v6 = vpop.xlane.xlu0 %30 }
  0xa3   :  { %v42_v7 = vpop.xlane.xlu1 %41  ;;  %v38_v8 = vpop.xlane.xlu0 %37 }
  0xa4   :  { %v43_v9 = vmax.f32 %v33_v5, %v42_v7  ;;  %v39_v10 = vadd.f32 %v38_v8, %v31_v6 }
  0xa6   :  { %47 = vst.msk [vmem:[%s122_s2] sm:$0xff] %vm45_vm1, %v43_v9  ;;  %v44_v11 = vmul.f32 0.0625, %v39_v10 }
  0xa8   :  { %46 = vst.msk [vmem:[%s121_s1] sm:$0xff] %vm45_vm1, %v44_v11 }
  0xa9   :  { %56 = vsyncpa [#allocation5], 1 }

</bundles_post_ra>
